<compile_context>
chip_gen: v7x
topology: tpu7x:2x2x1
jax: 0.10.0
libtpu: 0.0.40
codegen_flags: <defaults>
</compile_context>

<pallas_src>
import jax
import jax.numpy as jnp
from jax.experimental import pallas as pl
from jax.experimental.pallas import tpu as pltpu

_LANE = 128
_SUBLANE = 8


def _round_up(x, m):
    return ((x + m - 1) // m) * m


def _vmem_capacity_bytes():
    try:
        cap = int(pltpu.get_tpu_info().vmem_capacity_bytes)
        if cap > 0:
            return cap
    except Exception:
        pass
    return 64 * 1024 * 1024  # conservative default (v7x per-TC VMEM)


def _make_mix_kernel(n_streams, has_carry):
    """o = [carry +] sum_k w[k] * x_k  (f32 accumulation, cast on store)."""

    def kernel(w_ref, *refs):
        # w_ref: SMEM (n_streams,) f32  -- gamma * softmax(weights) chunk
        # refs:  n_streams VMEM input tiles (rt, lanes) [+ f32 carry tile], then output.
        x_refs = refs[:n_streams]
        if has_carry:
            carry_ref = refs[n_streams]
            o_ref = refs[n_streams + 1]
            acc = carry_ref[...].astype(jnp.float32)
            start = 0
        else:
            o_ref = refs[n_streams]
            acc = w_ref[0] * x_refs[0][...].astype(jnp.float32)
            start = 1
        for k in range(start, n_streams):   # small static unroll over layers
            acc = acc + w_ref[k] * x_refs[k][...].astype(jnp.float32)
        o_ref[...] = acc.astype(o_ref.dtype)

    return kernel


def _choose_layout(shape, n_elems, max_lanes):
    """Pick a (lanes, rows, pad_elems) 2-D view; lanes is always 128-aligned
    (or the full trailing dim when that dim is itself 128-aligned)."""
    last = int(shape[-1]) if len(shape) else 1
    if last % _LANE == 0:
        # Layout-preserving: only leading dims collapse; the minor dim is kept,
        # so there is no HBM relayout copy before the pallas_call.
        return last, n_elems // last, 0
    # Trailing dim not 128-aligned: flattened 2-D view with a 128-multiple lane
    # width (prefer an exact divisor -> no padding).
    for cand in (2048, 1024, 512, 256, 128):
        if cand <= max_lanes and n_elems % cand == 0:
            return cand, n_elems // cand, 0
    lanes = max(_LANE, (min(max_lanes, 512) // _LANE) * _LANE)
    padded = _round_up(n_elems, lanes)
    return lanes, padded // lanes, padded - n_elems


def _mix_chunk(xs2d, w_chunk, carry, out_dtype, rows, lanes,
               vmem_budget, vmem_cap, row_tile):
    """One pallas_call mixing a chunk of layers (optionally adding a carry)."""
    n_streams = len(xs2d)
    in_bytes = jnp.dtype(xs2d[0].dtype).itemsize
    out_bytes = jnp.dtype(out_dtype).itemsize
    carry_bytes = 4 if carry is not None else 0

    def footprint(rt):
        # double-buffered in/out streams + the full-tile f32 accumulator temp
        stream = n_streams * in_bytes + carry_bytes + out_bytes
        return (2 * stream + 4) * rt * lanes

    if rows <= _SUBLANE:
        rt = rows                                   # full (tiny) row dim
    else:
        cap_rt = row_tile if row_tile is not None else 1024
        rt = min(_round_up(rows, _SUBLANE), max(_SUBLANE, _round_up(cap_rt, _SUBLANE)))
        while rt > _SUBLANE and footprint(rt) > vmem_budget:
            rt = max(_SUBLANE, _round_up(rt // 2, _SUBLANE))
        # v7x megacore: keep >= 2 blocks along the parallel row axis.
        if rt >= rows:
            rt = max(_SUBLANE, _round_up(pl.cdiv(rows, 2), _SUBLANE))

    grid = (pl.cdiv(rows, rt),)
    vmem_limit = int(min(max(footprint(rt) + (8 << 20), 32 << 20),
                         int(0.85 * vmem_cap)))

    data_spec = lambda i: (i, 0)
    in_specs = ([pl.BlockSpec(memory_space=pltpu.MemorySpace.SMEM)]          # weights
                + [pl.BlockSpec((rt, lanes), data_spec) for _ in range(n_streams)])
    ins = [w_chunk] + list(xs2d)
    if carry is not None:
        in_specs.append(pl.BlockSpec((rt, lanes), data_spec))
        ins.append(carry)

    return pl.pallas_call(
        _make_mix_kernel(n_streams, carry is not None),
        out_shape=jax.ShapeDtypeStruct((rows, lanes), out_dtype),
        grid_spec=pl.GridSpec(
            grid=grid,
            in_specs=in_specs,
            out_specs=pl.BlockSpec((rt, lanes), data_spec),
        ),
        compiler_params=pltpu.CompilerParams(
            dimension_semantics=("parallel",),
            vmem_limit_bytes=vmem_limit,
        ),
    )(*ins)


def scalar_mix(tensors, weights, gamma, *, row_tile=None, max_lanes=2048,
               max_streams=8, vmem_budget_bytes=None):
    """Pallas ScalarMix forward.

    tensors: list of N arrays, all with identical shape/dtype
    weights: (N,) raw (un-normalised) mixing weights
    gamma:   (1,) global scale
    """
    n_layers = len(tensors)
    shape = tensors[0].shape
    out_dtype = tensors[0].dtype

    n_elems = 1
    for d in shape:
        n_elems *= int(d)

    # ---- parameter glue (O(N) scalars): fold gamma into the softmax weights.
    # TODO(synk): weight-level dropout (dropout > 0) would be applied here.
    w = (gamma.astype(jnp.float32).reshape(())
         * jax.nn.softmax(weights.astype(jnp.float32), axis=-1))

    lanes, rows, pad = _choose_layout(shape, n_elems, max_lanes)

    def as2d(t):
        if pad:
            flat = jnp.pad(t.reshape(n_elems), (0, pad))
            return flat.reshape(rows, lanes)
        return t.reshape(rows, lanes)

    xs = [as2d(t) for t in tensors]

    vmem_cap = _vmem_capacity_bytes()
    budget = int(0.7 * vmem_cap)
    if vmem_budget_bytes is not None:
        budget = min(budget, int(vmem_budget_bytes))

    # ---- chunk the layer dimension so the row tile stays large for big N.
    out = None
    carry = None
    start = 0
    while start < n_layers:
        stop = min(n_layers, start + max_streams)
        is_last = stop == n_layers
        out = _mix_chunk(xs[start:stop], w[start:stop], carry,
                         out_dtype if is_last else jnp.float32,
                         rows, lanes, budget, vmem_cap, row_tile)
        carry = out
        start = stop

    if pad:
        out = out.reshape(rows * lanes)[:n_elems]
    return out.reshape(shape)


def scalar_mix_reference(tensors, weights, gamma):
    s = jax.nn.softmax(weights.astype(jnp.float32), axis=-1)
    acc = sum(s[k] * tensors[k].astype(jnp.float32) for k in range(len(tensors)))
    return (gamma.reshape(()) * acc).astype(tensors[0].dtype)


if __name__ == "__main__":
    key = jax.random.PRNGKey(0)

    n_layers = 4
    weights = 0.1 * jax.random.normal(jax.random.fold_in(key, 0), (n_layers,), jnp.float32)
    gamma = jnp.array([1.3], jnp.float32)

    # 1) small shape, trailing dim NOT 128-aligned -> 128-multiple divisor fallback
    B, S, H = 2, 8, 32
    ks = jax.random.split(jax.random.fold_in(key, 1), n_layers)
    tensors = [jax.random.normal(ks[i], (B, S, H), jnp.float32) for i in range(n_layers)]
    out = jax.block_until_ready(scalar_mix(tensors, weights, gamma))
    ref = scalar_mix_reference(tensors, weights, gamma)
    assert out.shape == (B, S, H)
    assert jnp.allclose(out, ref, atol=1e-5, rtol=1e-5), "mismatch (small)"

    # 2) 128-aligned trailing dim -> layout-preserving view, multi-block grid + partial tail
    B2, S2, H2 = 2, 1028, 256
    ks2 = jax.random.split(jax.random.fold_in(key, 2), n_layers)
    tensors2 = [jax.random.normal(ks2[i], (B2, S2, H2), jnp.float32) for i in range(n_layers)]
    out2 = jax.block_until_ready(scalar_mix(tensors2, weights, gamma))
    ref2 = scalar_mix_reference(tensors2, weights, gamma)
    assert out2.shape == (B2, S2, H2)
    assert jnp.allclose(out2, ref2, atol=1e-5, rtol=1e-5), "mismatch (tiled)"

    # 3) layer-chunking path (max_streams < n_layers) with f32 carry between calls
    n3 = 5
    w3 = 0.2 * jax.random.normal(jax.random.fold_in(key, 3), (n3,), jnp.float32)
    ks3 = jax.random.split(jax.random.fold_in(key, 4), n3)
    tensors3 = [jax.random.normal(ks3[i], (2, 8, 128), jnp.float32) for i in range(n3)]
    out3 = jax.block_until_ready(scalar_mix(tensors3, w3, gamma, max_streams=2))
    ref3 = scalar_mix_reference(tensors3, w3, gamma)
    assert jnp.allclose(out3, ref3, atol=1e-5, rtol=1e-5), "mismatch (chunked)"

    # 4) padded fallback (element count not a multiple of 128)
    n4 = 3
    w4 = 0.3 * jax.random.normal(jax.random.fold_in(key, 5), (n4,), jnp.float32)
    ks4 = jax.random.split(jax.random.fold_in(key, 6), n4)
    tensors4 = [jax.random.normal(ks4[i], (2, 5, 3), jnp.float32) for i in range(n4)]
    out4 = jax.block_until_ready(scalar_mix(tensors4, w4, gamma))
    ref4 = scalar_mix_reference(tensors4, w4, gamma)
    assert out4.shape == (2, 5, 3)
    assert jnp.allclose(out4, ref4, atol=1e-5, rtol=1e-5), "mismatch (padded)"

    print("KERNEL_OK")
</pallas_src>

<mosaic_0001>
module attributes {stable_mosaic.version = 11 : i64} {
  func.func @kernel(%arg0: i32, %arg1: memref<4xf32, #tpu.memory_space<smem>>, %arg2: memref<1x512xf32, #tpu.memory_space<vmem>>, %arg3: memref<1x512xf32, #tpu.memory_space<vmem>>, %arg4: memref<1x512xf32, #tpu.memory_space<vmem>>, %arg5: memref<1x512xf32, #tpu.memory_space<vmem>>, %arg6: memref<1x512xf32, #tpu.memory_space<vmem>>) attributes {dimension_semantics = [#tpu.dimension_semantics<parallel>], iteration_bounds = array<i64: 1>, scalar_prefetch = 0 : i64, scratch_operands = 0 : i64, tpu.core_type = #tpu.core_type<tc>, window_params = [{transform_indices = @transform_0, window_bounds = array<i64: 4>}, {transform_indices = @transform_1, window_bounds = array<i64: 1, 512>}, {transform_indices = @transform_2, window_bounds = array<i64: 1, 512>}, {transform_indices = @transform_3, window_bounds = array<i64: 1, 512>}, {transform_indices = @transform_4, window_bounds = array<i64: 1, 512>}, {transform_indices = @transform_5, window_bounds = array<i64: 1, 512>}]} {
    %c0 = arith.constant 0 : index
    %0 = memref.load %arg1[%c0] : memref<4xf32, #tpu.memory_space<smem>>
    %c0_0 = arith.constant 0 : index
    %c0_1 = arith.constant 0 : index
    %1 = vector.load %arg2[%c0_0, %c0_1] : memref<1x512xf32, #tpu.memory_space<vmem>>, vector<1x512xf32>
    %2 = vector.broadcast %0 : f32 to vector<1x512xf32>
    %3 = arith.mulf %2, %1 : vector<1x512xf32>
    %c1 = arith.constant 1 : index
    %4 = memref.load %arg1[%c1] : memref<4xf32, #tpu.memory_space<smem>>
    %c0_2 = arith.constant 0 : index
    %c0_3 = arith.constant 0 : index
    %5 = vector.load %arg3[%c0_2, %c0_3] : memref<1x512xf32, #tpu.memory_space<vmem>>, vector<1x512xf32>
    %6 = vector.broadcast %4 : f32 to vector<1x512xf32>
    %7 = arith.mulf %6, %5 : vector<1x512xf32>
    %8 = arith.addf %3, %7 : vector<1x512xf32>
    %c2 = arith.constant 2 : index
    %9 = memref.load %arg1[%c2] : memref<4xf32, #tpu.memory_space<smem>>
    %c0_4 = arith.constant 0 : index
    %c0_5 = arith.constant 0 : index
    %10 = vector.load %arg4[%c0_4, %c0_5] : memref<1x512xf32, #tpu.memory_space<vmem>>, vector<1x512xf32>
    %11 = vector.broadcast %9 : f32 to vector<1x512xf32>
    %12 = arith.mulf %11, %10 : vector<1x512xf32>
    %13 = arith.addf %8, %12 : vector<1x512xf32>
    %c3 = arith.constant 3 : index
    %14 = memref.load %arg1[%c3] : memref<4xf32, #tpu.memory_space<smem>>
    %c0_6 = arith.constant 0 : index
    %c0_7 = arith.constant 0 : index
    %15 = vector.load %arg5[%c0_6, %c0_7] : memref<1x512xf32, #tpu.memory_space<vmem>>, vector<1x512xf32>
    %16 = vector.broadcast %14 : f32 to vector<1x512xf32>
    %17 = arith.mulf %16, %15 : vector<1x512xf32>
    %18 = arith.addf %13, %17 : vector<1x512xf32>
    %c0_8 = arith.constant 0 : index
    %c0_9 = arith.constant 0 : index
    %19 = vector.load %arg6[%c0_8, %c0_9] : memref<1x512xf32, #tpu.memory_space<vmem>>, vector<1x512xf32>
    tpu.vector_store %arg6[%c0_8, %c0_9], %18 {strides = array<i32>} : memref<1x512xf32, #tpu.memory_space<vmem>>, vector<1x512xf32>,
    return
  }
  func.func @transform_0(%arg0: i32) -> i32 {
    %c0_i32 = arith.constant 0 : i32
    %c0_i32_0 = arith.constant 0 : i32
    return %c0_i32 : i32
  }
  func.func @transform_1(%arg0: i32) -> (i32, i32) {
    %c0_i32 = arith.constant 0 : i32
    %c0_i32_0 = arith.constant 0 : i32
    return %arg0, %c0_i32 : i32, i32
  }
  func.func @transform_2(%arg0: i32) -> (i32, i32) {
    %c0_i32 = arith.constant 0 : i32
    %c0_i32_0 = arith.constant 0 : i32
    return %arg0, %c0_i32 : i32, i32
  }
  func.func @transform_3(%arg0: i32) -> (i32, i32) {
    %c0_i32 = arith.constant 0 : i32
    %c0_i32_0 = arith.constant 0 : i32
    return %arg0, %c0_i32 : i32, i32
  }
  func.func @transform_4(%arg0: i32) -> (i32, i32) {
    %c0_i32 = arith.constant 0 : i32
    %c0_i32_0 = arith.constant 0 : i32
    return %arg0, %c0_i32 : i32, i32
  }
  func.func @transform_5(%arg0: i32) -> (i32, i32) {
    %c0_i32 = arith.constant 0 : i32
    %c0_i32_0 = arith.constant 0 : i32
    return %arg0, %c0_i32 : i32, i32
  }
}

</mosaic_0001>

<bundles_post_ra>
// kernel: tpu_custom_call.1
= control target key start
LH: loop header
LB: loop body
LE: loop exit
PB: predicated region body
PF: predicated region fallthrough
CT: control target
= control target key end

     0   :  { %10 = vsyncpa [#allocation5], 0  ;;  %s228_s0 = inlined_call_operand.hbm [shape: f32[4], index: 0, kind: input, shape index: {}]   ;;  %s229_s1 = inlined_call_operand.hbm [shape: f32[1,512], index: 1, kind: input, shape index: {}]   ;;  %s230_s2 = inlined_call_operand.vmem [shape: f32[1,512], index: 2, kind: input, shape index: {}]   ;;  %s231_s3 = inlined_call_operand.vmem [shape: f32[1,512], index: 3, kind: input, shape index: {}]   ;;  %s232_s4 = inlined_call_operand.vmem [shape: f32[1,512], index: 4, kind: input, shape index: {}]   ;;  %s233_s5 = inlined_call_operand.hbm [shape: f32[1,512], index: 5, kind: output, shape index: {}]  }
   0x1   :  { %11 = vsyncpa [#allocation3], 0 }
   0x2   :  { %12 = vsyncpa [#allocation4], 0  ;;  %s90_s20 = scalar_lea.hbm %s228_s0, 16 }
   0x3   :  { %p91_p0 = scmp.ne.s32.totalorder %s228_s0, %s90_s20  ;;  %p94_p1 = scmp.lt.u32.totalorder %s90_s20, %s228_s0 }
   0x5   :  { %p96_p2 = pnand %p94_p1, %p91_p0 }
   0x7   :  { %99 = shalt.err (!%p96_p2)
}
   0x8   :  { %s150_s25 = smov [#allocation2]   ;;  %s151_s28 = smov [#allocation6]  }
   0x9   :  { %20 = dma.hbm_to_smem %s228_s0, 16, %s150_s25, [#allocation5]  }
   0xa   :  { %s27_s29 = sshll.u32 %s151_s28, 4  ;;  %s100_s7 = scalar_lea.hbm %s229_s1, 64  ;;  %s28_s29 = int_to_ptr.vmem [resolvable:$true] %s27_s29 }
   0xb   :  { %p101_p3 = scmp.ne.s32.totalorder %s229_s1, %s100_s7  ;;  %p104_p4 = scmp.lt.u32.totalorder %s100_s7, %s229_s1 }
   0xd   :  { %p106_p5 = pnand %p104_p4, %p101_p3 }
   0xf   :  { %109 = shalt.err (!%p106_p5)
}
  0x10   :  { %s110_s12 = scalar_lea.vmem %s28_s29, 64  ;;  %p115_p7 = scmp.lt.s32.totalorder %s28_s29, %s28_s29 }
  0x11   :  { %p111_p6 = scmp.ne.s32.totalorder %s28_s29, %s110_s12  ;;  %p116_p8 = scmp.lt.s32.totalorder %s110_s12, %s110_s12 }
  0x13   :  { %p117_p9 = por %p116_p8, %p115_p7 }
  0x15   :  { %p118_p10 = pnand %p117_p9, %p111_p6 }
  0x17   :  { %121 = shalt.err (!%p118_p10)
}
  0x18   :  { %30 = dma.hbm_to_vmem [thread:$0]  %s229_s1, 64, %s28_s29, [#allocation3]  }
  0x19   :  { %144 = dma.done.wait [#allocation5], 16  }
  0x1a   :  { %145 = vsyncadd [#allocation5], 4294967280 }
  0x1b   :  { %146 = dma.done.wait [#allocation3], 64  }
  0x1c   :  { %147 = vsyncadd [#allocation3], 4294967232 }
  0x1d   :  { %43 = sfence }
  0x1e   :  { %s44_s14 = sld [smem:[#allocation2]]  ;;  %s84_s15 = sld [smem:[#allocation2 + $0x1]]  ;;  %v45_v0 = vld [vmem:[#allocation6] sm:$0xf]  ;;  %v49_v1 = vld [vmem:[%s230_s2] sm:$0xf]  ;;  %v63_v11 = vlaneseq }
  0x1f   :  { %s85_s16 = sld [smem:[#allocation2 + $0x2]]  ;;  %s86_s17 = sld [smem:[#allocation2 + $0x3]]  ;;  %v54_v2 = vld [vmem:[%s231_s3] sm:$0xf] }
  0x20   :  { %v59_v5 = vld [vmem:[%s232_s4] sm:$0xf]  ;;  %s152_s23 = smov [#allocation7]   ;;  %vm65_vm0 = vcmp.lt.s32.totalorder %v63_v11, 512 }
  0x21   :  { %s74_s2 = sshll.u32 %s152_s23, 4  ;;  %s75_s2 = int_to_ptr.vmem [resolvable:$true] %s74_s2 }
  0x22   :  { %s122_s3 = scalar_lea.vmem %s75_s2, 64  ;;  %p127_p12 = scmp.lt.s32.totalorder %s75_s2, %s75_s2 }
  0x23   :  { %p123_p11 = scmp.ne.s32.totalorder %s75_s2, %s122_s3  ;;  %p128_p13 = scmp.lt.s32.totalorder %s122_s3, %s122_s3 }
  0x24   :  { %v46_v3 = vstv %s44_s14  ;;  %v50_v4 = vstv %s84_s15 }
  0x25   :  { %v47_v6 = vmul.f32 %v46_v3, %v45_v0  ;;  %v51_v7 = vmul.f32 %v50_v4, %v49_v1  ;;  %v55_v8 = vstv %s85_s16  ;;  %v60_v10 = vstv %s86_s17  ;;  %p129_p0 = por %p128_p13, %p127_p12 }
  0x26   :  { %v56_v9 = vmul.f32 %v55_v8, %v54_v2  ;;  %v61_v13 = vmul.f32 %v60_v10, %v59_v5 }
  0x27   :  { %v52_v12 = vadd.f32 %v51_v7, %v47_v6  ;;  %p130_p1 = pnand %p129_p0, %p123_p11 }
  0x29   :  { %v57_v14 = vadd.f32 %v56_v9, %v52_v12 }
  0x2b   :  { %v62_v15 = vadd.f32 %v61_v13, %v57_v14 }
  0x2d   :  { %67 = vst.msk [vmem:[#allocation7] sm:$0xf] %vm65_vm0, %v62_v15 }
  0x2e   :  { %133 = shalt.err (!%p130_p1)
}
  0x2f   :  { %s134_s25 = scalar_lea.hbm %s233_s5, 64 }
  0x30   :  { %p135_p2 = scmp.ne.s32.totalorder %s233_s5, %s134_s25  ;;  %p138_p3 = scmp.lt.u32.totalorder %s134_s25, %s233_s5 }
  0x32   :  { %p140_p4 = pnand %p138_p3, %p135_p2 }
  0x34   :  { %143 = shalt.err (!%p140_p4)
}
  0x35   :  { %77 = dma.vmem_to_hbm [thread:$0]  %s75_s2, 64, %s233_s5, [#allocation4]  }
  0x36   :  { %148 = dma.done.wait [#allocation4], 64  }
  0x37   :  { %149 = vsyncadd [#allocation4], 4294967232 }
  0x38   :  { %81 = vsyncpa [#allocation3], 1 }
  0x39   :  { %82 = vsyncpa [#allocation4], 1 }
  0x3a   :  { %83 = vsyncpa [#allocation5], 1 }

</bundles_post_ra>
